<compile_context>
chip_gen: v7x
topology: tpu7x:2x2x1
jax: 0.10.0
libtpu: 0.0.40
codegen_flags: <defaults>
</compile_context>

<pallas_src>
import functools

import jax
import jax.numpy as jnp
from jax import lax
from jax.experimental import pallas as pl
from jax.experimental.pallas import tpu as pltpu


def _semiring_conv_kernel(src_ref, rel_ref,            # [tE,1] int32 (VMEM)
                          dst_ref, ew_ref,             # [1,1,tE] (VMEM, lane-dense)
                          x_ref, bnd_ref, relw_ref,    # resident tables (VMEM)
                          wT_ref, b_ref,               # Linear params (VMEM)
                          out_ref, msg_ref):           # outputs
    i = pl.program_id(0)
    n_tiles = pl.num_programs(0)
    t_e = msg_ref.shape[0]
    n_node = x_ref.shape[0]
    n_rel = relw_ref.shape[0]

    # ---- init persistent [N, D] accumulator from boundary (first tile only) ----
    @pl.when(i == 0)
    def _():
        out_ref[...] = bnd_ref[...]

    src = src_ref[...]                                   # [tE, 1] int32
    rel = rel_ref[...]                                   # [tE, 1] int32

    # ---- vectorized gather on the MXU (exact: one 1.0 per one-hot row) ----
    src_oh = (lax.broadcasted_iota(jnp.int32, (t_e, n_node), 1) == src
              ).astype(jnp.float32)                      # [tE, N]
    x_g = jnp.dot(src_oh, x_ref[...],
                  preferred_element_type=jnp.float32)    # [tE, D]

    rel_oh = (lax.broadcasted_iota(jnp.int32, (t_e, n_rel), 1) == rel
              ).astype(jnp.float32)                      # [tE, R]
    r_g = jnp.dot(rel_oh, relw_ref[...],
                  preferred_element_type=jnp.float32)    # [tE, D]

    # ---- DistMult message; single lane-dense [tE, D] store ----
    msg = x_g * r_g
    msg_ref[...] = msg

    # ---- weighted scatter-add in canonical [N,tE] @ [tE,D] orientation ----
    # edge_weight folded into the one-hot (padded edges have weight 0).
    dst_row = dst_ref[0]                                 # [1, tE] int32
    ew_row = ew_ref[0]                                   # [1, tE] f32
    scat_oh = jnp.where(
        lax.broadcasted_iota(jnp.int32, (n_node, t_e), 0) == dst_row,
        ew_row, 0.0)                                     # [N, tE]
    out_ref[...] += jnp.dot(scat_oh, msg,
                            preferred_element_type=jnp.float32)

    # ---- epilogue (last tile only): update + Linear(update), then ReLU ----
    @pl.when(i == n_tiles - 1)
    def _():
        u = out_ref[...]                                 # [N, D]
        hidden = jnp.dot(u, wT_ref[...],
                         preferred_element_type=jnp.float32) + b_ref[...]
        out_ref[...] = jnp.maximum(u + hidden, 0.0)


def semiring_graph_conv(edge_src, edge_dst, edge_rel, edge_weight,
                        node_input, boundary, relation_weight,
                        lin_weight, lin_bias, *, block_edges=512):
    """Returns (output [N,D], message [E,D], relation_weight [R,D])."""
    N, D = node_input.shape
    R = relation_weight.shape[0]
    E = edge_src.shape[0]

    # edge-tile size: multiple of 8 (128 preferred for MXU contraction dim)
    block_edges = max(8, (block_edges // 8) * 8)

    # pad edges to a multiple of block_edges; padded edges use index 0 and
    # weight 0 so they contribute nothing to the scatter-add.  msg rows >= E
    # are padding garbage and are sliced off below.
    E_pad = pl.cdiv(E, block_edges) * block_edges
    pad = E_pad - E
    n_tiles = E_pad // block_edges

    src = jnp.pad(edge_src.reshape(-1).astype(jnp.int32),
                  (0, pad)).reshape(E_pad, 1)
    rel = jnp.pad(edge_rel.reshape(-1).astype(jnp.int32),
                  (0, pad)).reshape(E_pad, 1)
    dst = jnp.pad(edge_dst.reshape(-1).astype(jnp.int32),
                  (0, pad)).reshape(n_tiles, 1, block_edges)
    ew = jnp.pad(edge_weight.reshape(-1).astype(jnp.float32),
                 (0, pad)).reshape(n_tiles, 1, block_edges)

    wT = lin_weight.T.astype(jnp.float32)        # host-side relayout (free)
    bias2d = lin_bias.reshape(1, -1).astype(jnp.float32)

    flops = (2 * E_pad * N * D          # src one-hot gather
             + 2 * E_pad * R * D        # rel one-hot gather
             + 2 * E_pad * D            # DistMult product
             + 2 * N * E_pad * D        # scatter matmul
             + 2 * N * D * D)           # epilogue Linear
    bytes_accessed = 4 * (4 * E_pad                 # edge index / weight tiles
                          + 3 * N * D               # node input, boundary, out
                          + R * D + D * D + D       # relation table, Linear
                          + E_pad * D)              # message output

    # explicit VMEM budget: resident tables (x2 buffers), per-tile buffers
    # (x2), one-hot intermediates, plus headroom; clamped to [32, 64] MiB so
    # it is valid on v7x (64 MiB physical) as well as v5e/v6e.
    resident = 4 * (3 * N * D + R * D + D * D + D)
    per_tile = 4 * (block_edges * D + 4 * block_edges)
    onehots = 4 * (2 * block_edges * N + block_edges * R + 2 * block_edges * D)
    vmem_limit = int(max(32 << 20,
                         min(2 * resident + 2 * per_tile + onehots + (4 << 20),
                             64 << 20)))

    grid_spec = pltpu.PrefetchScalarGridSpec(
        num_scalar_prefetch=0,
        grid=(n_tiles,),
        in_specs=[
            pl.BlockSpec((block_edges, 1), lambda i: (i, 0)),      # edge_src
            pl.BlockSpec((block_edges, 1), lambda i: (i, 0)),      # edge_rel
            pl.BlockSpec((1, 1, block_edges), lambda i: (i, 0, 0)),  # edge_dst
            pl.BlockSpec((1, 1, block_edges), lambda i: (i, 0, 0)),  # edge_weight
            pl.BlockSpec((N, D), lambda i: (0, 0)),                # node_input
            pl.BlockSpec((N, D), lambda i: (0, 0)),                # boundary
            pl.BlockSpec((R, D), lambda i: (0, 0)),                # relation table
            pl.BlockSpec((D, D), lambda i: (0, 0)),                # lin_weight.T
            pl.BlockSpec((1, D), lambda i: (0, 0)),                # lin_bias
        ],
        out_specs=(
            pl.BlockSpec((N, D), lambda i: (0, 0)),                # persistent acc
            pl.BlockSpec((block_edges, D), lambda i: (i, 0)),      # message tiles
        ),
    )

    out, msg = pl.pallas_call(
        _semiring_conv_kernel,
        out_shape=(jax.ShapeDtypeStruct((N, D), jnp.float32),
                   jax.ShapeDtypeStruct((E_pad, D), jnp.float32)),
        grid_spec=grid_spec,
        compiler_params=pltpu.CompilerParams(
            dimension_semantics=("arbitrary",),
            vmem_limit_bytes=vmem_limit),
        cost_estimate=pl.CostEstimate(flops=flops, transcendentals=0,
                                      bytes_accessed=bytes_accessed),
    )(src, rel, dst, ew,
      node_input.astype(jnp.float32), boundary.astype(jnp.float32),
      relation_weight.astype(jnp.float32), wT, bias2d)

    return out, msg[:E], relation_weight


def _reference(edge_src, edge_dst, edge_rel, edge_weight,
               node_input, boundary, relation_weight, lin_weight, lin_bias):
    src, dst, rel = edge_src[:, 0], edge_dst[:, 0], edge_rel[:, 0]
    msg = node_input[src] * relation_weight[rel]
    weighted = msg * edge_weight
    update = jnp.zeros_like(boundary).at[dst].add(weighted) + boundary
    hidden = update @ lin_weight.T + lin_bias
    out = jax.nn.relu(update + hidden)
    return out, msg


if __name__ == "__main__":
    # small synthetic graph consistent with the module's forward
    N, E, R, D = 16, 200, 8, 128   # num_node, num_edge, num_relation, input_dim==output_dim

    key = jax.random.PRNGKey(0)
    ks = jax.random.split(key, 8)

    edge_src = jax.random.randint(ks[0], (E, 1), 0, N, dtype=jnp.int32)
    edge_dst = jax.random.randint(ks[1], (E, 1), 0, N, dtype=jnp.int32)
    edge_rel = jax.random.randint(ks[2], (E, 1), 0, R, dtype=jnp.int32)
    edge_weight = jax.random.uniform(ks[3], (E, 1), jnp.float32, 0.5, 1.5)

    node_input = jax.random.normal(ks[4], (N, D), jnp.float32)
    boundary = jax.random.normal(ks[5], (N, D), jnp.float32)

    # synthetic parameters (shapes match nn.Embedding(R, D) and
    # torchdrug layers.MLP(D, [D]) == nn.Linear(D, D))
    relation_weight = jax.random.normal(ks[6], (R, D), jnp.float32)
    wk, bk = jax.random.split(ks[7])
    lin_weight = jax.random.normal(wk, (D, D), jnp.float32) * (1.0 / jnp.sqrt(D))
    lin_bias = jax.random.normal(bk, (D,), jnp.float32) * 0.01

    # block_edges=128 -> 2 edge tiles (E_pad=256), exercising the persistent
    # accumulator path across grid steps.
    out, msg, relw = semiring_graph_conv(
        edge_src, edge_dst, edge_rel, edge_weight,
        node_input, boundary, relation_weight, lin_weight, lin_bias,
        block_edges=128)
    jax.block_until_ready((out, msg, relw))

    ref_out, ref_msg = _reference(
        edge_src, edge_dst, edge_rel, edge_weight,
        node_input, boundary, relation_weight, lin_weight, lin_bias)
    assert jnp.allclose(out, ref_out, atol=1e-4, rtol=1e-4)
    assert jnp.allclose(msg, ref_msg, atol=1e-4, rtol=1e-4)
    assert jnp.allclose(relw, relation_weight)

    print("KERNEL_OK")
</pallas_src>

<mosaic_0001>
module attributes {stable_mosaic.version = 11 : i64} {
  func.func @_semiring_conv_kernel(%arg0: i32, %arg1: memref<128x1xi32, #tpu.memory_space<vmem>>, %arg2: memref<128x1xi32, #tpu.memory_space<vmem>>, %arg3: memref<1x1x128xi32, #tpu.memory_space<vmem>>, %arg4: memref<1x1x128xf32, #tpu.memory_space<vmem>>, %arg5: memref<16x128xf32, #tpu.memory_space<vmem>>, %arg6: memref<16x128xf32, #tpu.memory_space<vmem>>, %arg7: memref<8x128xf32, #tpu.memory_space<vmem>>, %arg8: memref<128x128xf32, #tpu.memory_space<vmem>>, %arg9: memref<1x128xf32, #tpu.memory_space<vmem>>, %arg10: memref<16x128xf32, #tpu.memory_space<vmem>>, %arg11: memref<128x128xf32, #tpu.memory_space<vmem>>) attributes {dimension_semantics = [#tpu.dimension_semantics<arbitrary>], iteration_bounds = array<i64: 2>, scalar_prefetch = 0 : i64, scratch_operands = 0 : i64, tpu.core_type = #tpu.core_type<tc>, window_params = [{transform_indices = @transform_0, window_bounds = array<i64: 128, 1>}, {transform_indices = @transform_1, window_bounds = array<i64: 128, 1>}, {transform_indices = @transform_2, window_bounds = array<i64: 1, 1, 128>}, {transform_indices = @transform_3, window_bounds = array<i64: 1, 1, 128>}, {pipeline_mode = #tpu.pipeline_mode<synchronous>, transform_indices = @transform_4, window_bounds = array<i64: 16, 128>}, {pipeline_mode = #tpu.pipeline_mode<synchronous>, transform_indices = @transform_5, window_bounds = array<i64: 16, 128>}, {pipeline_mode = #tpu.pipeline_mode<synchronous>, transform_indices = @transform_6, window_bounds = array<i64: 8, 128>}, {pipeline_mode = #tpu.pipeline_mode<synchronous>, transform_indices = @transform_7, window_bounds = array<i64: 128, 128>}, {pipeline_mode = #tpu.pipeline_mode<synchronous>, transform_indices = @transform_8, window_bounds = array<i64: 1, 128>}, {pipeline_mode = #tpu.pipeline_mode<synchronous>, transform_indices = @transform_9, window_bounds = array<i64: 16, 128>}, {transform_indices = @transform_10, window_bounds = array<i64: 128, 128>}]} {
    %c0_i32 = arith.constant 0 : i32
    %0 = arith.cmpi eq, %arg0, %c0_i32 : i32
    %1 = arith.extui %0 : i1 to i32
    %c0_i32_0 = arith.constant 0 : i32
    %2 = arith.cmpi ne, %1, %c0_i32_0 : i32
    scf.if %2 {
      %c0_24 = arith.constant 0 : index
      %c0_25 = arith.constant 0 : index
      %39 = vector.load %arg6[%c0_24, %c0_25] : memref<16x128xf32, #tpu.memory_space<vmem>>, vector<16x128xf32>
      %c0_26 = arith.constant 0 : index
      %c0_27 = arith.constant 0 : index
      %40 = vector.load %arg10[%c0_26, %c0_27] : memref<16x128xf32, #tpu.memory_space<vmem>>, vector<16x128xf32>
      tpu.vector_store %arg10[%c0_26, %c0_27], %39 {strides = array<i32>} : memref<16x128xf32, #tpu.memory_space<vmem>>, vector<16x128xf32>,
    } else {
    }
    %c0 = arith.constant 0 : index
    %c0_1 = arith.constant 0 : index
    %3 = vector.load %arg1[%c0, %c0_1] : memref<128x1xi32, #tpu.memory_space<vmem>>, vector<128x1xi32>
    %c0_2 = arith.constant 0 : index
    %c0_3 = arith.constant 0 : index
    %4 = vector.load %arg2[%c0_2, %c0_3] : memref<128x1xi32, #tpu.memory_space<vmem>>, vector<128x1xi32>
    %5 = tpu.iota {dimensions = array<i32: 1>} : vector<128x16xi32>
    %6 = vector.broadcast %3 : vector<128x1xi32> to vector<128x16xi32>
    %7 = arith.cmpi eq, %5, %6 : vector<128x16xi32>
    %8 = arith.extui %7 : vector<128x16xi1> to vector<128x16xi32>
    %9 = arith.sitofp %8 : vector<128x16xi32> to vector<128x16xf32>
    %c0_4 = arith.constant 0 : index
    %c0_5 = arith.constant 0 : index
    %10 = vector.load %arg5[%c0_4, %c0_5] : memref<16x128xf32, #tpu.memory_space<vmem>>, vector<16x128xf32>
    %cst = arith.constant dense<0.000000e+00> : vector<128x128xf32>
    %11 = tpu.matmul %9, %10, %cst {dimension_numbers = #tpu.dot_dimension_numbers<[1], [0], [0], [1], [0, 0, 1, 1], [], []>} : vector<128x16xf32>, vector<16x128xf32>, vector<128x128xf32> -> vector<128x128xf32>
    %12 = tpu.iota {dimensions = array<i32: 1>} : vector<128x8xi32>
    %13 = vector.broadcast %4 : vector<128x1xi32> to vector<128x8xi32>
    %14 = arith.cmpi eq, %12, %13 : vector<128x8xi32>
    %15 = arith.extui %14 : vector<128x8xi1> to vector<128x8xi32>
    %16 = arith.sitofp %15 : vector<128x8xi32> to vector<128x8xf32>
    %c0_6 = arith.constant 0 : index
    %c0_7 = arith.constant 0 : index
    %17 = vector.load %arg7[%c0_6, %c0_7] : memref<8x128xf32, #tpu.memory_space<vmem>>, vector<8x128xf32>
    %cst_8 = arith.constant dense<0.000000e+00> : vector<128x128xf32>
    %18 = tpu.matmul %16, %17, %cst_8 {dimension_numbers = #tpu.dot_dimension_numbers<[1], [0], [0], [1], [0, 0, 1, 1], [], []>} : vector<128x8xf32>, vector<8x128xf32>, vector<128x128xf32> -> vector<128x128xf32>
    %19 = arith.mulf %11, %18 : vector<128x128xf32>
    %c0_9 = arith.constant 0 : index
    %c0_10 = arith.constant 0 : index
    %20 = vector.load %arg11[%c0_9, %c0_10] : memref<128x128xf32, #tpu.memory_space<vmem>>, vector<128x128xf32>
    tpu.vector_store %arg11[%c0_9, %c0_10], %19 {strides = array<i32>} : memref<128x128xf32, #tpu.memory_space<vmem>>, vector<128x128xf32>,
    %c0_11 = arith.constant 0 : index
    %c0_12 = arith.constant 0 : index
    %c0_13 = arith.constant 0 : index
    %21 = vector.load %arg3[%c0_11, %c0_12, %c0_13] : memref<1x1x128xi32, #tpu.memory_space<vmem>>, vector<1x1x128xi32>
    %22 = vector.shape_cast %21 : vector<1x1x128xi32> to vector<1x128xi32>
    %c0_14 = arith.constant 0 : index
    %c0_15 = arith.constant 0 : index
    %c0_16 = arith.constant 0 : index
    %23 = vector.load %arg4[%c0_14, %c0_15, %c0_16] : memref<1x1x128xf32, #tpu.memory_space<vmem>>, vector<1x1x128xf32>
    %24 = vector.shape_cast %23 : vector<1x1x128xf32> to vector<1x128xf32>
    %25 = tpu.iota {dimensions = array<i32: 0>} : vector<16x128xi32>
    %26 = vector.broadcast %22 : vector<1x128xi32> to vector<16x128xi32>
    %27 = arith.cmpi eq, %25, %26 : vector<16x128xi32>
    %cst_17 = arith.constant 0.000000e+00 : f32
    %28 = vector.shape_cast %24 : vector<1x128xf32> to vector<1x128xf32>
    %29 = vector.broadcast %28 : vector<1x128xf32> to vector<16x128xf32>
    %30 = vector.broadcast %cst_17 : f32 to vector<16x128xf32>
    %31 = arith.select %27, %29, %30 : vector<16x128xi1>, vector<16x128xf32>
    %c0_18 = arith.constant 0 : index
    %c0_19 = arith.constant 0 : index
    %32 = vector.load %arg10[%c0_18, %c0_19] : memref<16x128xf32, #tpu.memory_space<vmem>>, vector<16x128xf32>
    %cst_20 = arith.constant dense<0.000000e+00> : vector<16x128xf32>
    %33 = tpu.matmul %31, %19, %cst_20 {dimension_numbers = #tpu.dot_dimension_numbers<[1], [0], [0], [1], [0, 0, 1, 1], [], []>} : vector<16x128xf32>, vector<128x128xf32>, vector<16x128xf32> -> vector<16x128xf32>
    %34 = arith.addf %32, %33 : vector<16x128xf32>
    %c0_21 = arith.constant 0 : index
    %c0_22 = arith.constant 0 : index
    %35 = vector.load %arg10[%c0_21, %c0_22] : memref<16x128xf32, #tpu.memory_space<vmem>>, vector<16x128xf32>
    tpu.vector_store %arg10[%c0_21, %c0_22], %34 {strides = array<i32>} : memref<16x128xf32, #tpu.memory_space<vmem>>, vector<16x128xf32>,
    %c1_i32 = arith.constant 1 : i32
    %36 = arith.cmpi eq, %arg0, %c1_i32 : i32
    %37 = arith.extui %36 : i1 to i32
    %c0_i32_23 = arith.constant 0 : i32
    %38 = arith.cmpi ne, %37, %c0_i32_23 : i32
    scf.if %38 {
      %c0_24 = arith.constant 0 : index
      %c0_25 = arith.constant 0 : index
      %39 = vector.load %arg10[%c0_24, %c0_25] : memref<16x128xf32, #tpu.memory_space<vmem>>, vector<16x128xf32>
      %c0_26 = arith.constant 0 : index
      %c0_27 = arith.constant 0 : index
      %40 = vector.load %arg8[%c0_26, %c0_27] : memref<128x128xf32, #tpu.memory_space<vmem>>, vector<128x128xf32>
      %cst_28 = arith.constant dense<0.000000e+00> : vector<16x128xf32>
      %41 = tpu.matmul %39, %40, %cst_28 {dimension_numbers = #tpu.dot_dimension_numbers<[1], [0], [0], [1], [0, 0, 1, 1], [], []>} : vector<16x128xf32>, vector<128x128xf32>, vector<16x128xf32> -> vector<16x128xf32>
      %c0_29 = arith.constant 0 : index
      %c0_30 = arith.constant 0 : index
      %42 = vector.load %arg9[%c0_29, %c0_30] : memref<1x128xf32, #tpu.memory_space<vmem>>, vector<1x128xf32>
      %43 = vector.broadcast %42 : vector<1x128xf32> to vector<16x128xf32>
      %44 = arith.addf %41, %43 : vector<16x128xf32>
      %45 = arith.addf %39, %44 : vector<16x128xf32>
      %cst_31 = arith.constant 0.000000e+00 : f32
      %46 = vector.broadcast %cst_31 : f32 to vector<16x128xf32>
      %47 = arith.maximumf %45, %46 : vector<16x128xf32>
      %c0_32 = arith.constant 0 : index
      %c0_33 = arith.constant 0 : index
      %48 = vector.load %arg10[%c0_32, %c0_33] : memref<16x128xf32, #tpu.memory_space<vmem>>, vector<16x128xf32>
      tpu.vector_store %arg10[%c0_32, %c0_33], %47 {strides = array<i32>} : memref<16x128xf32, #tpu.memory_space<vmem>>, vector<16x128xf32>,
    } else {
    }
    return
  }
  func.func @transform_0(%arg0: i32) -> (i32, i32) {
    %c0_i32 = arith.constant 0 : i32
    %c0_i32_0 = arith.constant 0 : i32
    return %arg0, %c0_i32 : i32, i32
  }
  func.func @transform_1(%arg0: i32) -> (i32, i32) {
    %c0_i32 = arith.constant 0 : i32
    %c0_i32_0 = arith.constant 0 : i32
    return %arg0, %c0_i32 : i32, i32
  }
  func.func @transform_2(%arg0: i32) -> (i32, i32, i32) {
    %c0_i32 = arith.constant 0 : i32
    %c0_i32_0 = arith.constant 0 : i32
    %c0_i32_1 = arith.constant 0 : i32
    return %arg0, %c0_i32, %c0_i32_0 : i32, i32, i32
  }
  func.func @transform_3(%arg0: i32) -> (i32, i32, i32) {
    %c0_i32 = arith.constant 0 : i32
    %c0_i32_0 = arith.constant 0 : i32
    %c0_i32_1 = arith.constant 0 : i32
    return %arg0, %c0_i32, %c0_i32_0 : i32, i32, i32
  }
  func.func @transform_4(%arg0: i32) -> (i32, i32) {
    %c0_i32 = arith.constant 0 : i32
    %c0_i32_0 = arith.constant 0 : i32
    %c0_i32_1 = arith.constant 0 : i32
    return %c0_i32, %c0_i32_0 : i32, i32
  }
  func.func @transform_5(%arg0: i32) -> (i32, i32) {
    %c0_i32 = arith.constant 0 : i32
    %c0_i32_0 = arith.constant 0 : i32
    %c0_i32_1 = arith.constant 0 : i32
    return %c0_i32, %c0_i32_0 : i32, i32
  }
  func.func @transform_6(%arg0: i32) -> (i32, i32) {
    %c0_i32 = arith.constant 0 : i32
    %c0_i32_0 = arith.constant 0 : i32
    %c0_i32_1 = arith.constant 0 : i32
    return %c0_i32, %c0_i32_0 : i32, i32
  }
  func.func @transform_7(%arg0: i32) -> (i32, i32) {
    %c0_i32 = arith.constant 0 : i32
    %c0_i32_0 = arith.constant 0 : i32
    %c0_i32_1 = arith.constant 0 : i32
    return %c0_i32, %c0_i32_0 : i32, i32
  }
  func.func @transform_8(%arg0: i32) -> (i32, i32) {
    %c0_i32 = arith.constant 0 : i32
    %c0_i32_0 = arith.constant 0 : i32
    %c0_i32_1 = arith.constant 0 : i32
    return %c0_i32, %c0_i32_0 : i32, i32
  }
  func.func @transform_9(%arg0: i32) -> (i32, i32) {
    %c0_i32 = arith.constant 0 : i32
    %c0_i32_0 = arith.constant 0 : i32
    %c0_i32_1 = arith.constant 0 : i32
    return %c0_i32, %c0_i32_0 : i32, i32
  }
  func.func @transform_10(%arg0: i32) -> (i32, i32) {
    %c0_i32 = arith.constant 0 : i32
    %c0_i32_0 = arith.constant 0 : i32
    return %arg0, %c0_i32 : i32, i32
  }
}

</mosaic_0001>

<bundles_post_ra>
// kernel: tpu_custom_call.1
= control target key start
LH: loop header
LB: loop body
LE: loop exit
PB: predicated region body
PF: predicated region fallthrough
CT: control target
= control target key end

     0   :  { %16 = vsyncpa [#allocation3], 0  ;;  %s2365_s0 = inlined_call_operand.vmem [shape: s32[256,1], index: 0, kind: input, shape index: {}]   ;;  %s2366_s1 = inlined_call_operand.vmem [shape: s32[256,1], index: 1, kind: input, shape index: {}]   ;;  %s2367_s2 = inlined_call_operand.vmem [shape: s32[2,1,128], index: 2, kind: input, shape index: {}]   ;;  %s2368_s3 = inlined_call_operand.vmem [shape: f32[2,1,128], index: 3, kind: input, shape index: {}]   ;;  %s2369_s4 = inlined_call_operand.vmem [shape: f32[16,128], index: 4, kind: input, shape index: {}]   ;;  %s2370_s5 = inlined_call_operand.vmem [shape: f32[16,128], index: 5, kind: input, shape index: {}]   ;;  %s2371_s6 = inlined_call_operand.vmem [shape: f32[8,128], index: 6, kind: input, shape index: {}]   ;;  %s2372_s7 = inlined_call_operand.vmem [shape: f32[128,128], index: 7, kind: input, shape index: {}]   ;;  %s2373_s8 = inlined_call_operand.vmem [shape: f32[1,128], index: 8, kind: input, shape index: {}]   ;;  %s2374_s9 = inlined_call_operand.hbm [shape: f32[16,128], index: 9, kind: output, shape index: {0}]   ;;  %s2375_s10 = inlined_call_operand.hbm [shape: f32[256,128], index: 10, kind: output, shape index: {1}]  }
   0x1   :  { %17 = vsyncpa [#allocation5], 0 }
   0x2   :  { %19 = vsyncpa [#allocation5 + $0x1], 0  ;;  %s1967_s13 = smov 0   ;;  %s1969_s14 = smov 0  }
   0x3   :  { %s1971_s15 = smov 0   ;;  %s1973_s16 = smov 0  }
   0x4 LB: > { %2383 = sst [smem:[#allocation8_spill]] %s1892_s13  ;;  %s1988_s17 = sadd.s32 4294967295, %s1904_s16   ;;  %s1904_s16 = sphi %s1973_s16, %s2395_s16   ;;  %s1900_s15 = sphi %s1971_s15, %s2397_s15   ;;  %s1896_s14 = sphi %s1969_s14, %s2399_s14   ;;  %s1892_s13 = sphi %s1967_s13, %s2398_s13  }
   0x5   : > { %2384 = sst [smem:[#allocation9_spill]] %s1900_s15  ;;  %s1409_s18 = sadd.s32 4294967294, %s1904_s16  }
   0x6   : > { %2385 = sst [smem:[#allocation10_spill]] %s1904_s16  ;;  %s1992_s19 = sadd.s32 1, %s1904_s16  }
   0x7   : > { %2386 = sst [smem:[#allocation11_spill]] %s1992_s19  ;;  %s262_s20 = sadd.s32 1, %s1900_s15 }
   0x8   : > { %s259_s21 = ssub.s32 %s1904_s16, %s1992_s19  ;;  %p272_p0 = scmp.ne.s32.totalorder %s1900_s15, %s1896_s14 }
   0x9   : > { %p260_p1 = scmp.eq.s32.totalorder %s259_s21, 0  ;;  %p273_p2 = scmp.eq.s32.totalorder %s1988_s17, 1 }
   0xa   : > { %p278_p3 = scmp.ne.s32.totalorder %s1896_s14, %s1892_s13  ;;  %p279_p4 = scmp.eq.s32.totalorder %s1409_s18, 1 }
   0xb   : > { %s2003_s22 = scalar_select %p260_p1, %s1900_s15, %s262_s20  }
   0xc   : > { %p2007_p5 = por %p273_p2, %p272_p0  ;;  %p2011_p6 = por %p279_p4, %p278_p3 }
   0xd   : > { %2387 = sst [smem:[#allocation12_spill]] %s2003_s22  ;;  %p1412_p7 = scmp.ge.s32.totalorder %s1904_s16, 1 }
   0xe   : > { %s2389_s24 = scalar_select %p2011_p6, 1, 0 }
   0xf   : > { %p342_p8 = scmp.lt.s32.totalorder %s1904_s16, 3 }
  0x10   : > { %2390 = sst [smem:[#allocation13_spill]] %s2389_s24 }
  0x11   : > { %p343_p9 = pnand %p1412_p7, %p342_p8 }
  0x12   : > { %s2376_s25 = sand.u32 (!%p343_p9), 1, %s1896_s14   ;;  %s1414_s26 = sshll.u32 (!%p343_p9), %s1988_s17, 4 }
  0x13   : > { %346 = sbr.rel (%p343_p9) target bundleno = 941 (0x3ad), region = 56  ;;  %s1413_s27 = sshll.u32 (!%p343_p9), %s2376_s25, 7 }
  0x14   : > { %p392_p10 = scmp.lt.s32.totalorder (!%p343_p9), %s1414_s26, 31  ;;  %p403_p11 = scmp.lt.s32.totalorder (!%p343_p9), %s1988_s17, 1 }
  0x15   : > { %s2043_s16 = scalar_lea.vmem (!%p343_p9), [#allocation4], %s1413_s27  ;;  %p1418_p12 = scmp.ne.s32.totalorder (!%p343_p9), %s1988_s17, 0 }
  0x1a   : > { %s2401_s26 = smov (!%p392_p10, %s1414_s26), 31  ;;  %413 = sbr.rel (%p1418_p12) target bundleno = 33 (0x21), region = 60 }
  0x1b   : > { %s2023_s28 = scalar_select %p403_p11, %s1988_s17, 1 }
  0x1c   : > { %s1415_s29 = sshll.u32 %s2401_s26, 3  ;;  %v414_v0 = vld [vmem:[%s2370_s5] sm:$0xff] (!%p1418_p12)  ;;  %v415_v1 = vld [vmem:[%s2370_s5 + $0x8] sm:$0xff] (!%p1418_p12) }
  0x1d   : > { %s2028_s12 = scalar_lea.vmem %s2365_s0, %s1415_s29  ;;  %s2033_s21 = scalar_lea.vmem %s2366_s1, %s1415_s29  ;;  %416 = vst [vmem:[#allocation2] sm:$0xff] (!%p1418_p12), %v414_v0  ;;  %417 = vst [vmem:[#allocation2 + $0x8] sm:$0xff] (!%p1418_p12), %v415_v1 }
  0x1e   : > { %s405_s15 = scalar_lea.vmem %s2367_s2, %s2023_s28  ;;  %s408_s13 = scalar_lea.vmem %s2368_s3, %s2023_s28 }
  0x21 PF: > { %v419_v2 = vld [vmem:[%s2028_s12 + $0x8] sm:$0xff]  ;;  %v418_v3 = vld [vmem:[%s2028_s12] sm:$0xff]  ;;  %v1906_v4 = vmov 0   ;;  %v436_v7 = vld [vmem:[%s2033_s21 + $0x10] sm:$0xff]  ;;  %v450_v39 = vlaneseq  ;;  %vm550_vm0 = vcmask 130048   ;;  %v1907_v43 = vmov 0.0  }
  0x22   : > { %1811 = vset.pattern.permute.xlu1 %v1906_v4  ;;  %1810 = vset.pattern.permute.xlu0 %v1906_v4  ;;  %v435_v5 = vld [vmem:[%s2033_s21 + $0x8] sm:$0xff]  ;;  %v434_v6 = vld [vmem:[%s2033_s21] sm:$0xff]  ;;  %v420_v8 = vld [vmem:[%s2028_s12 + $0x10] sm:$0xff]  ;;  %vm841_vm3 = vcmask 64512   ;;  %p1487_p13 = scmp.ne.s32.totalorder %s1988_s17, 1 }
  0x23   : > { %456 = vperm.xlu1 %1811, %v419_v2   ;;  %453 = vperm.xlu0 %1810, %v418_v3   ;;  %v437_v9 = vld [vmem:[%s2033_s21 + $0x18] sm:$0xff]  ;;  %v548_v10 = vld [vmem:[%s2369_s4] sm:$0xff]  ;;  %v549_v12 = vld [vmem:[%s2369_s4 + $0x8] sm:$0xff]  ;;  %v2094_v40 = vand.u32 127, %v450_v39 }
  0x24   : > { %v421_v11 = vld [vmem:[%s2028_s12 + $0x18] sm:$0xff]  ;;  %v840_v13 = vld [vmem:[%s2371_s6] sm:$0xff]  ;;  %v1692_v14 = vpack.c.bf16 %v549_v12, %v548_v10  ;;  %v439_v17 = vld [vmem:[%s2033_s21 + $0x28] sm:$0xff] }
  0x25   : > { %1596 = vmatprep.subr.mxu1 %v840_v13  ;;  %v438_v15 = vld [vmem:[%s2033_s21 + $0x20] sm:$0xff]  ;;  %v423_v18 = vld [vmem:[%s2028_s12 + $0x28] sm:$0xff]  ;;  %v440_v19 = vld [vmem:[%s2033_s21 + $0x30] sm:$0xff] }
  0x26   : > { %1597 = vmatpush3.msra.mxu1 %v840_v13  ;;  %v422_v16 = vld [vmem:[%s2028_s12 + $0x20] sm:$0xff]  ;;  %1693 = vmatprep.subr.bf16.mxu0 %v1692_v14  ;;  %v424_v20 = vld [vmem:[%s2028_s12 + $0x30] sm:$0xff]  ;;  %v441_v21 = vld [vmem:[%s2033_s21 + $0x38] sm:$0xff] }
  0x27   : > { %748 = vperm.xlu1 %1811, %v435_v5   ;;  %745 = vperm.xlu0 %1810, %v434_v6   ;;  %v425_v22 = vld [vmem:[%s2028_s12 + $0x38] sm:$0xff]  ;;  %v442_v23 = vld [vmem:[%s2033_s21 + $0x40] sm:$0xff]  ;;  %v443_v25 = vld [vmem:[%s2033_s21 + $0x48] sm:$0xff] }
  0x28   : > { %1695 = vmatpush3.bf16.msra.mxu0 %v1692_v14  ;;  %v426_v24 = vld [vmem:[%s2028_s12 + $0x40] sm:$0xff]  ;;  %v427_v26 = vld [vmem:[%s2028_s12 + $0x48] sm:$0xff]  ;;  %v444_v27 = vld [vmem:[%s2033_s21 + $0x50] sm:$0xff] }
  0x29   : > { %v428_v28 = vld [vmem:[%s2028_s12 + $0x50] sm:$0xff]  ;;  %v445_v29 = vld [vmem:[%s2033_s21 + $0x58] sm:$0xff]  ;;  %v446_v31 = vld [vmem:[%s2033_s21 + $0x60] sm:$0xff] }
  0x2a   : > { %v429_v30 = vld [vmem:[%s2028_s12 + $0x58] sm:$0xff]  ;;  %v430_v32 = vld [vmem:[%s2028_s12 + $0x60] sm:$0xff]  ;;  %v447_v33 = vld [vmem:[%s2033_s21 + $0x68] sm:$0xff] }
  0x2b   : > { %751 = vperm.xlu1 %1811, %v436_v7   ;;  %459 = vperm.xlu0 %1810, %v420_v8   ;;  %v431_v34 = vld [vmem:[%s2028_s12 + $0x68] sm:$0xff]  ;;  %v448_v35 = vld [vmem:[%s2033_s21 + $0x70] sm:$0xff]  ;;  %v449_v37 = vld [vmem:[%s2033_s21 + $0x78] sm:$0xff] }
  0x2c   : > { %v432_v36 = vld [vmem:[%s2028_s12 + $0x70] sm:$0xff]  ;;  %v433_v38 = vld [vmem:[%s2028_s12 + $0x78] sm:$0xff] }
  0x2f   : > { %754 = vperm.xlu1 %1811, %v437_v9   ;;  %462 = vperm.xlu0 %1810, %v421_v11  }
  0x33   : > { %757 = vperm.xlu1 %1811, %v438_v15   ;;  %465 = vperm.xlu0 %1810, %v422_v16  }
  0x37   : > { %760 = vperm.xlu1 %1811, %v439_v17   ;;  %468 = vperm.xlu0 %1810, %v423_v18  }
  0x3b   : > { %763 = vperm.xlu1 %1811, %v440_v19   ;;  %471 = vperm.xlu0 %1810, %v424_v20  }
  0x3f   : > { %766 = vperm.xlu1 %1811, %v441_v21   ;;  %474 = vperm.xlu0 %1810, %v425_v22  }
  0x43   : > { %769 = vperm.xlu1 %1811, %v442_v23   ;;  %477 = vperm.xlu0 %1810, %v426_v24  }
  0x47   : > { %772 = vperm.xlu1 %1811, %v443_v25   ;;  %480 = vperm.xlu0 %1810, %v427_v26  }
  0x4b   : > { %775 = vperm.xlu1 %1811, %v444_v27   ;;  %483 = vperm.xlu0 %1810, %v428_v28  }
  0x4f   : > { %778 = vperm.xlu1 %1811, %v445_v29   ;;  %486 = vperm.xlu0 %1810, %v429_v30  }
  0x53   : > { %781 = vperm.xlu1 %1811, %v446_v31   ;;  %489 = vperm.xlu0 %1810, %v430_v32  }
  0x57   : > { %784 = vperm.xlu1 %1811, %v447_v33   ;;  %492 = vperm.xlu0 %1810, %v431_v34  }
  0x5b   : > { %787 = vperm.xlu1 %1811, %v448_v35   ;;  %495 = vperm.xlu0 %1810, %v432_v36  }
  0x5f   : > { %790 = vperm.xlu1 %1811, %v449_v37   ;;  %498 = vperm.xlu0 %1810, %v433_v38  }
  0xa2   : > { %v457_v41 = vpop.permute.xlu1 %456  ;;  %v454_v42 = vpop.permute.xlu0 %453 }
  0xa3   : > { %vm501_vm1 = vcmp.eq.s32.totalorder %v2094_v40, %v457_v41  ;;  %vm500_vm2 = vcmp.eq.s32.totalorder %v2094_v40, %v454_v42 }
  0xa4   : > { %v1420_v44 = vsel %vm501_vm1, 1.0, %v1907_v43  ;;  %v1419_v45 = vsel %vm500_vm2, 1.0, %v1907_v43 }
  0xa5   : > { %1572 = vmatprep.mubr.msk.f32.mxu0 %vm550_vm0, %v1419_v45  ;;  %v1070_v45 = vshrl.u32 %v450_v39, 7 }
  0xa6   : > { %v749_v46 = vpop.permute.xlu1 %748  ;;  %1573 = vmatmul.mubr.msk.f32.vlgmr.msra.gmra.mrb[0].mxu0 %vm550_vm0, %v1420_v44  ;;  %v746_v47 = vpop.permute.xlu0 %745 }
  0xa7   : > { %vm793_vm4 = vcmp.eq.s32.totalorder %v2094_v40, %v749_v46  ;;  %vm792_vm5 = vcmp.eq.s32.totalorder %v2094_v40, %v746_v47  ;;  %v2198_v46 = vld [vmem:[%s405_s15] ss:$0 sm:$0xff] }
  0xa8   : > { %v1452_v48 = vsel %vm793_vm4, 1.0, %v1907_v43  ;;  %v1451_v49 = vsel %vm792_vm5, 1.0, %v1907_v43 }
  0xa9   : > { %1598 = vmatprep.mubr.msk.f32.mxu1 %vm841_vm3, %v1451_v49 }
  0xaa   : > { %v752_v50 = vpop.permute.xlu1 %751  ;;  %1599 = vmatmul.mubr.msk.f32.vlgmr.msra.gmra.mrb[0].mxu1 %vm841_vm3, %v1452_v48  ;;  %v460_v51 = vpop.permute.xlu0 %459 }
  0xab   : > { %vm794_vm6 = vcmp.eq.s32.totalorder %v2094_v40, %v752_v50  ;;  %vm502_vm7 = vcmp.eq.s32.totalorder %v2094_v40, %v460_v51 }
  0xac   : > { %v1453_v52 = vsel %vm794_vm6, 1.0, %v1907_v43  ;;  %v1421_v53 = vsel %vm502_vm7, 1.0, %v1907_v43 }
  0xad   : > { %1575 = vmatprep.mubr.msk.f32.mxu0 %vm550_vm0, %v1421_v53  ;;  %1601 = vmatprep.mubr.msk.f32.mxu1 %vm841_vm3, %v1453_v52 }
  0xae   : > { %v755_v54 = vpop.permute.xlu1 %754  ;;  %v463_v55 = vpop.permute.xlu0 %462 }
  0xaf   : > { %vm795_vm8 = vcmp.eq.s32.totalorder %v2094_v40, %v755_v54  ;;  %vm503_vm9 = vcmp.eq.s32.totalorder %v2094_v40, %v463_v55 }
  0xb0   : > { %v1454_v56 = vsel %vm795_vm8, 1.0, %v1907_v43  ;;  %v1422_v57 = vsel %vm503_vm9, 1.0, %v1907_v43 }
  0xb1   : > { %1576 = vmatmul.mubr.msk.f32.gmra.mrb[2].mxu0 %vm550_vm0, %v1422_v57  ;;  %1602 = vmatmul.mubr.msk.f32.gmra.mrb[2].mxu1 %vm841_vm3, %v1454_v56 }
  0xb2   : > { %v758_v58 = vpop.permute.xlu1 %757  ;;  %v466_v59 = vpop.permute.xlu0 %465 }
  0xb3   : > { %vm796_vm10 = vcmp.eq.s32.totalorder %v2094_v40, %v758_v58  ;;  %vm504_vm11 = vcmp.eq.s32.totalorder %v2094_v40, %v466_v59 }
  0xb4   : > { %v1455_v60 = vsel %vm796_vm10, 1.0, %v1907_v43  ;;  %v1423_v61 = vsel %vm504_vm11, 1.0, %v1907_v43 }
  0xb5   : > { %1578 = vmatprep.mubr.msk.f32.mxu0 %vm550_vm0, %v1423_v61  ;;  %1604 = vmatprep.mubr.msk.f32.mxu1 %vm841_vm3, %v1455_v60 }
  0xb6   : > { %v761_v62 = vpop.permute.xlu1 %760  ;;  %v469_v63 = vpop.permute.xlu0 %468 }
  0xb7   : > { %vm797_vm12 = vcmp.eq.s32.totalorder %v2094_v40, %v761_v62  ;;  %vm505_vm13 = vcmp.eq.s32.totalorder %v2094_v40, %v469_v63 }
  0xb8   : > { %v1456_v0 = vsel %vm797_vm12, 1.0, %v1907_v43  ;;  %v1424_v1 = vsel %vm505_vm13, 1.0, %v1907_v43 }
  0xb9   : > { %1579 = vmatmul.mubr.msk.f32.gmra.mrb[4].mxu0 %vm550_vm0, %v1424_v1  ;;  %1605 = vmatmul.mubr.msk.f32.gmra.mrb[4].mxu1 %vm841_vm3, %v1456_v0 }
  0xba   : > { %v764_v2 = vpop.permute.xlu1 %763  ;;  %v472_v3 = vpop.permute.xlu0 %471 }
  0xbb   : > { %vm798_vm14 = vcmp.eq.s32.totalorder %v2094_v40, %v764_v2  ;;  %vm506_vm15 = vcmp.eq.s32.totalorder %v2094_v40, %v472_v3 }
  0xbc   : > { %v1457_v4 = vsel %vm798_vm14, 1.0, %v1907_v43  ;;  %v1425_v5 = vsel %vm506_vm15, 1.0, %v1907_v43 }
  0xbd   : > { %1581 = vmatprep.mubr.msk.f32.mxu0 %vm550_vm0, %v1425_v5  ;;  %1607 = vmatprep.mubr.msk.f32.mxu1 %vm841_vm3, %v1457_v4 }
  0xbe   : > { %v767_v6 = vpop.permute.xlu1 %766  ;;  %v475_v7 = vpop.permute.xlu0 %474 }
  0xbf   : > { %vm799_vm1 = vcmp.eq.s32.totalorder %v2094_v40, %v767_v6  ;;  %vm507_vm2 = vcmp.eq.s32.totalorder %v2094_v40, %v475_v7 }
  0xc0   : > { %v1458_v8 = vsel %vm799_vm1, 1.0, %v1907_v43  ;;  %v1426_v9 = vsel %vm507_vm2, 1.0, %v1907_v43 }
  0xc1   : > { %1582 = vmatmul.mubr.msk.f32.gmra.mrb[6].mxu0 %vm550_vm0, %v1426_v9  ;;  %1608 = vmatmul.mubr.msk.f32.gmra.mrb[6].mxu1 %vm841_vm3, %v1458_v8 }
  0xc2   : > { %v770_v10 = vpop.permute.xlu1 %769  ;;  %v478_v11 = vpop.permute.xlu0 %477 }
  0xc3   : > { %vm800_vm4 = vcmp.eq.s32.totalorder %v2094_v40, %v770_v10  ;;  %vm508_vm5 = vcmp.eq.s32.totalorder %v2094_v40, %v478_v11 }
  0xc4   : > { %v1459_v12 = vsel %vm800_vm4, 1.0, %v1907_v43  ;;  %v1427_v13 = vsel %vm508_vm5, 1.0, %v1907_v43 }
  0xc5   : > { %1584 = vmatprep.mubr.msk.f32.mxu0 %vm550_vm0, %v1427_v13  ;;  %1610 = vmatprep.mubr.msk.f32.mxu1 %vm841_vm3, %v1459_v12 }
  0xc6   : > { %v773_v14 = vpop.permute.xlu1 %772  ;;  %v481_v15 = vpop.permute.xlu0 %480 }
  0xc7   : > { %vm801_vm6 = vcmp.eq.s32.totalorder %v2094_v40, %v773_v14  ;;  %vm509_vm7 = vcmp.eq.s32.totalorder %v2094_v40, %v481_v15 }
  0xc8   : > { %v1460_v16 = vsel %vm801_vm6, 1.0, %v1907_v43  ;;  %v1428_v17 = vsel %vm509_vm7, 1.0, %v1907_v43 }
  0xc9   : > { %1585 = vmatmul.mubr.msk.f32.gmra.mrb[8].mxu0 %vm550_vm0, %v1428_v17  ;;  %1611 = vmatmul.mubr.msk.f32.gmra.mrb[8].mxu1 %vm841_vm3, %v1460_v16 }
  0xca   : > { %v776_v18 = vpop.permute.xlu1 %775  ;;  %v484_v19 = vpop.permute.xlu0 %483 }
  0xcb   : > { %vm802_vm8 = vcmp.eq.s32.totalorder %v2094_v40, %v776_v18  ;;  %vm510_vm9 = vcmp.eq.s32.totalorder %v2094_v40, %v484_v19 }
  0xcc   : > { %v1461_v20 = vsel %vm802_vm8, 1.0, %v1907_v43  ;;  %v1429_v21 = vsel %vm510_vm9, 1.0, %v1907_v43 }
  0xcd   : > { %1587 = vmatprep.mubr.msk.f32.mxu0 %vm550_vm0, %v1429_v21  ;;  %1613 = vmatprep.mubr.msk.f32.mxu1 %vm841_vm3, %v1461_v20 }
  0xce   : > { %v779_v22 = vpop.permute.xlu1 %778  ;;  %v487_v23 = vpop.permute.xlu0 %486 }
  0xcf   : > { %vm803_vm10 = vcmp.eq.s32.totalorder %v2094_v40, %v779_v22  ;;  %vm511_vm11 = vcmp.eq.s32.totalorder %v2094_v40, %v487_v23 }
  0xd0   : > { %v1462_v24 = vsel %vm803_vm10, 1.0, %v1907_v43  ;;  %v1430_v25 = vsel %vm511_vm11, 1.0, %v1907_v43 }
  0xd1   : > { %1588 = vmatmul.mubr.msk.f32.gmra.mrb[10].mxu0 %vm550_vm0, %v1430_v25  ;;  %1614 = vmatmul.mubr.msk.f32.gmra.mrb[10].mxu1 %vm841_vm3, %v1462_v24 }
  0xd2   : > { %v782_v26 = vpop.permute.xlu1 %781  ;;  %v490_v27 = vpop.permute.xlu0 %489 }
  0xd3   : > { %vm804_vm12 = vcmp.eq.s32.totalorder %v2094_v40, %v782_v26  ;;  %vm512_vm13 = vcmp.eq.s32.totalorder %v2094_v40, %v490_v27 }
  0xd4   : > { %v1463_v28 = vsel %vm804_vm12, 1.0, %v1907_v43  ;;  %v1431_v29 = vsel %vm512_vm13, 1.0, %v1907_v43 }
  0xd5   : > { %1590 = vmatprep.mubr.msk.f32.mxu0 %vm550_vm0, %v1431_v29  ;;  %1616 = vmatprep.mubr.msk.f32.mxu1 %vm841_vm3, %v1463_v28 }
  0xd6   : > { %v785_v30 = vpop.permute.xlu1 %784  ;;  %v493_v31 = vpop.permute.xlu0 %492 }
  0xd7   : > { %vm805_vm14 = vcmp.eq.s32.totalorder %v2094_v40, %v785_v30  ;;  %vm513_vm15 = vcmp.eq.s32.totalorder %v2094_v40, %v493_v31 }
  0xd8   : > { %v1464_v32 = vsel %vm805_vm14, 1.0, %v1907_v43  ;;  %v1432_v33 = vsel %vm513_vm15, 1.0, %v1907_v43 }
  0xd9   : > { %1591 = vmatmul.mubr.msk.f32.gmra.mrb[12].mxu0 %vm550_vm0, %v1432_v33  ;;  %1617 = vmatmul.mubr.msk.f32.gmra.mrb[12].mxu1 %vm841_vm3, %v1464_v32 }
  0xda   : > { %v788_v34 = vpop.permute.xlu1 %787  ;;  %v496_v35 = vpop.permute.xlu0 %495 }
  0xdb   : > { %vm806_vm1 = vcmp.eq.s32.totalorder %v2094_v40, %v788_v34  ;;  %vm514_vm2 = vcmp.eq.s32.totalorder %v2094_v40, %v496_v35 }
  0xdc   : > { %v1465_v36 = vsel %vm806_vm1, 1.0, %v1907_v43  ;;  %v1433_v37 = vsel %vm514_vm2, 1.0, %v1907_v43 }
  0xdd   : > { %1593 = vmatprep.mubr.msk.f32.mxu0 %vm550_vm0, %v1433_v37  ;;  %1619 = vmatprep.mubr.msk.f32.mxu1 %vm841_vm3, %v1465_v36 }
  0xde   : > { %v791_v38 = vpop.permute.xlu1 %790  ;;  %v499_v41 = vpop.permute.xlu0 %498 }
  0xdf   : > { %vm807_vm4 = vcmp.eq.s32.totalorder %v2094_v40, %v791_v38  ;;  %vm515_vm5 = vcmp.eq.s32.totalorder %v2094_v40, %v499_v41  ;;  %v2205_v40 = vld [vmem:[%s408_s13] ss:$0 sm:$0xff]  ;;  %v1087_v38 = vld [vmem:[#allocation2 + $0x8] sm:$0xff] }
  0xe0   : > { %v1466_v42 = vsel %vm807_vm4, 1.0, %v1907_v43  ;;  %v1434_v44 = vsel %vm515_vm5, 1.0, %v1907_v43  ;;  %v2207_v43 = vadd.s32 8, %v1070_v45  ;;  %v1086_v41 = vld [vmem:[#allocation2] sm:$0xff] }
  0xe1   : > { %1594 = vmatmul.mubr.msk.f32.gmra.mrb[14].mxu0 %vm550_vm0, %v1434_v44  ;;  %1620 = vmatmul.mubr.msk.f32.gmra.mrb[14].mxu1 %vm841_vm3, %v1466_v42  ;;  %vm1076_vm0 = vcmp.eq.s32.totalorder %v1070_v45, %v2198_v46 }
  0xe2   : > { %vm1077_vm3 = vcmp.eq.s32.totalorder %v2207_v43, %v2198_v46  ;;  %1654 = vmatprep.mubr.msk.f32.mxu1 %vm1076_vm0, %v2205_v40  ;;  %v1174_v46 = vld [vmem:[%s2372_s7 + $0x8] sm:$0xff] (!%p1487_p13) }
 0x179   : > { %v1574_v39 = vpop.f32.mrb[0].mxu0 }
 0x17a   : > { %v665_v47 = vpop.f32.mrb[1].mxu0 }
 0x17d   : > { %v1600_v48 = vpop.f32.mrb[0].mxu1 }
 0x17e   : > { %v1036_v49 = vmul.f32 %v1600_v48, %v1574_v39  ;;  %v956_v50 = vpop.f32.mrb[1].mxu1  ;;  %v1176_v48 = vld [vmem:[%s2372_s7 + $0x18] sm:$0xff] (!%p1487_p13) }
 0x17f   : > { %v1035_v51 = vmul.f32 %v956_v50, %v665_v47  ;;  %v1173_v47 = vld [vmem:[%s2372_s7] sm:$0xff] (!%p1487_p13) }
 0x180   : > { %1052 = vst [vmem:[%s2043_s16 + $0x8] sm:$0xff] %v1036_v49  ;;  %v1728_v43 = vpack.c.bf16 (!%p1487_p13), %v1174_v46, %v1173_v47  ;;  %v1177_v50 = vld [vmem:[%s2372_s7 + $0x20] sm:$0xff] (!%p1487_p13) }
 0x181   : > { %1051 = vst [vmem:[%s2043_s16] sm:$0xff] %v1035_v51  ;;  %v1696_v52 = vpack.c.bf16 %v1036_v49, %v1035_v51  ;;  %v1178_v51 = vld [vmem:[%s2372_s7 + $0x28] sm:$0xff] (!%p1487_p13) }
 0x182   : > { %1729 = vmatprep.subr.bf16.mxu0 (!%p1487_p13), %v1728_v43 }
 0x183   : > { %1697 = vmatprep.subr.bf16.mxu1 %v1696_v52  ;;  %1731 = vmatpush3.bf16.msra.mxu0 (!%p1487_p13), %v1728_v43 }
 0x184   : > { %v1577_v53 = vpop.f32.mrb[2].mxu0  ;;  %v1603_v54 = vpop.f32.mrb[2].mxu1  ;;  %1699 = vmatpush3.bf16.msra.mxu1 %v1696_v52  ;;  %v1736_v52 = vpack.c.bf16 (!%p1487_p13), %v1178_v51, %v1177_v50 }
 0x185   : > { %v1038_v55 = vmul.f32 %v1603_v54, %v1577_v53  ;;  %v675_v56 = vpop.f32.mrb[3].mxu0  ;;  %v966_v57 = vpop.f32.mrb[3].mxu1  ;;  %v1179_v54 = vld [vmem:[%s2372_s7 + $0x30] sm:$0xff] (!%p1487_p13) }
 0x186   : > { %v1037_v58 = vmul.f32 %v966_v57, %v675_v56  ;;  %v1181_v57 = vld [vmem:[%s2372_s7 + $0x40] sm:$0xff] (!%p1487_p13) }
 0x187   : > { %1054 = vst [vmem:[%s2043_s16 + $0x18] sm:$0xff] %v1038_v55 }
 0x188   : > { %1053 = vst [vmem:[%s2043_s16 + $0x10] sm:$0xff] %v1037_v58  ;;  %v1700_v59 = vpack.c.bf16 %v1038_v55, %v1037_v58  ;;  %v1180_v55 = vld [vmem:[%s2372_s7 + $0x38] sm:$0xff] (!%p1487_p13)  ;;  %v1182_v58 = vld [vmem:[%s2372_s7 + $0x48] sm:$0xff] (!%p1487_p13) }
 0x189   : > { %v1740_v56 = vpack.c.bf16 (!%p1487_p13), %v1180_v55, %v1179_v54 }
 0x18a   : > { %1701 = vmatprep.subr.bf16.mxu1 %v1700_v59 }
 0x18b   : > { %1703 = vmatpush3.bf16.msra.mxu1 %v1700_v59  ;;  %v1744_v59 = vpack.c.bf16 (!%p1487_p13), %v1182_v58, %v1181_v57 }
 0x18c   : > { %v1580_v60 = vpop.f32.mrb[4].mxu0  ;;  %v1606_v61 = vpop.f32.mrb[4].mxu1 }
 0x18d   : > { %v1040_v62 = vmul.f32 %v1606_v61, %v1580_v60  ;;  %v685_v63 = vpop.f32.mrb[5].mxu0  ;;  %v976_v0 = vpop.f32.mrb[5].mxu1  ;;  %v1183_v60 = vld [vmem:[%s2372_s7 + $0x50] sm:$0xff] (!%p1487_p13)  ;;  %v1184_v61 = vld [vmem:[%s2372_s7 + $0x58] sm:$0xff] (!%p1487_p13) }
 0x18e   : > { %v1039_v1 = vmul.f32 %v976_v0, %v685_v63  ;;  %v1185_v63 = vld [vmem:[%s2372_s7 + $0x60] sm:$0xff] (!%p1487_p13)  ;;  %v1186_v0 = vld [vmem:[%s2372_s7 + $0x68] sm:$0xff] (!%p1487_p13) }
 0x18f   : > { %1056 = vst [vmem:[%s2043_s16 + $0x28] sm:$0xff] %v1040_v62 }
 0x190   : > { %1055 = vst [vmem:[%s2043_s16 + $0x20] sm:$0xff] %v1039_v1  ;;  %v1704_v2 = vpack.c.bf16 %v1040_v62, %v1039_v1  ;;  %v1748_v62 = vpack.c.bf16 (!%p1487_p13), %v1184_v61, %v1183_v60  ;;  %v1752_v1 = vpack.c.bf16 (!%p1487_p13), %v1186_v0, %v1185_v63 }
 0x192   : > { %1705 = vmatprep.subr.bf16.mxu1 %v1704_v2 }
 0x193   : > { %1707 = vmatpush3.bf16.msra.mxu1 %v1704_v2  ;;  %v1187_v2 = vld [vmem:[%s2372_s7 + $0x70] sm:$0xff] (!%p1487_p13) }
 0x194   : > { %v1583_v3 = vpop.f32.mrb[6].mxu0  ;;  %v1609_v4 = vpop.f32.mrb[6].mxu1 }
 0x195   : > { %v1042_v5 = vmul.f32 %v1609_v4, %v1583_v3  ;;  %v695_v6 = vpop.f32.mrb[7].mxu0  ;;  %v986_v7 = vpop.f32.mrb[7].mxu1  ;;  %v1188_v3 = vld [vmem:[%s2372_s7 + $0x78] sm:$0xff] (!%p1487_p13) }
 0x196   : > { %v1041_v8 = vmul.f32 %v986_v7, %v695_v6  ;;  %v1756_v4 = vpack.c.bf16 (!%p1487_p13), %v1188_v3, %v1187_v2  ;;  %v1488_v6 = vld [vmem:[%s2373_s8] ss:$0 sm:$0xff] (!%p1487_p13) }
 0x197   : > { %1058 = vst [vmem:[%s2043_s16 + $0x38] sm:$0xff] %v1042_v5 }
 0x198   : > { %1057 = vst [vmem:[%s2043_s16 + $0x30] sm:$0xff] %v1041_v8  ;;  %v1708_v9 = vpack.c.bf16 %v1042_v5, %v1041_v8 }
 0x19a   : > { %1709 = vmatprep.subr.bf16.mxu1 %v1708_v9 }
 0x19b   : > { %1711 = vmatpush3.bf16.msra.mxu1 %v1708_v9 }
 0x19c   : > { %v1586_v10 = vpop.f32.mrb[8].mxu0  ;;  %v1612_v11 = vpop.f32.mrb[8].mxu1 }
 0x19d   : > { %v1044_v12 = vmul.f32 %v1612_v11, %v1586_v10  ;;  %v705_v13 = vpop.f32.mrb[9].mxu0  ;;  %v996_v14 = vpop.f32.mrb[9].mxu1 }
 0x19e   : > { %v1043_v15 = vmul.f32 %v996_v14, %v705_v13 }
 0x19f   : > { %1060 = vst [vmem:[%s2043_s16 + $0x48] sm:$0xff] %v1044_v12 }
 0x1a0   : > { %1059 = vst [vmem:[%s2043_s16 + $0x40] sm:$0xff] %v1043_v15  ;;  %v1712_v16 = vpack.c.bf16 %v1044_v12, %v1043_v15 }
 0x1a2   : > { %1713 = vmatprep.subr.bf16.mxu1 %v1712_v16 }
 0x1a3   : > { %1715 = vmatpush3.bf16.msra.mxu1 %v1712_v16 }
 0x1a4   : > { %v1589_v17 = vpop.f32.mrb[10].mxu0  ;;  %v1615_v18 = vpop.f32.mrb[10].mxu1 }
 0x1a5   : > { %v1046_v19 = vmul.f32 %v1615_v18, %v1589_v17  ;;  %v715_v20 = vpop.f32.mrb[11].mxu0  ;;  %v1006_v21 = vpop.f32.mrb[11].mxu1 }
 0x1a6   : > { %v1045_v22 = vmul.f32 %v1006_v21, %v715_v20 }
 0x1a7   : > { %1062 = vst [vmem:[%s2043_s16 + $0x58] sm:$0xff] %v1046_v19 }
 0x1a8   : > { %1061 = vst [vmem:[%s2043_s16 + $0x50] sm:$0xff] %v1045_v22  ;;  %v1716_v23 = vpack.c.bf16 %v1046_v19, %v1045_v22 }
 0x1aa   : > { %1717 = vmatprep.subr.bf16.mxu1 %v1716_v23 }
 0x1ab   : > { %1719 = vmatpush3.bf16.msra.mxu1 %v1716_v23 }
 0x1ac   : > { %v1592_v24 = vpop.f32.mrb[12].mxu0  ;;  %v1618_v25 = vpop.f32.mrb[12].mxu1 }
 0x1ad   : > { %v1048_v26 = vmul.f32 %v1618_v25, %v1592_v24  ;;  %v725_v27 = vpop.f32.mrb[13].mxu0  ;;  %v1016_v28 = vpop.f32.mrb[13].mxu1 }
 0x1ae   : > { %v1047_v29 = vmul.f32 %v1016_v28, %v725_v27 }
 0x1af   : > { %1064 = vst [vmem:[%s2043_s16 + $0x68] sm:$0xff] %v1048_v26 }
 0x1b0   : > { %1063 = vst [vmem:[%s2043_s16 + $0x60] sm:$0xff] %v1047_v29  ;;  %v1720_v30 = vpack.c.bf16 %v1048_v26, %v1047_v29 }
 0x1b2   : > { %1721 = vmatprep.subr.bf16.mxu1 %v1720_v30 }
 0x1b3   : > { %1723 = vmatpush3.bf16.msra.mxu1 %v1720_v30 }
 0x1b4   : > { %v1595_v31 = vpop.f32.mrb[14].mxu0  ;;  %v1621_v32 = vpop.f32.mrb[14].mxu1 }
 0x1b5   : > { %v1050_v33 = vmul.f32 %v1621_v32, %v1595_v31  ;;  %v735_v34 = vpop.f32.mrb[15].mxu0  ;;  %v1026_v35 = vpop.f32.mrb[15].mxu1 }
 0x1b6   : > { %v1049_v36 = vmul.f32 %v1026_v35, %v735_v34 }
 0x1b7   : > { %1066 = vst [vmem:[%s2043_s16 + $0x78] sm:$0xff] %v1050_v33 }
 0x1b8   : > { %1065 = vst [vmem:[%s2043_s16 + $0x70] sm:$0xff] %v1049_v36  ;;  %v1724_v37 = vpack.c.bf16 %v1050_v33, %v1049_v36 }
 0x1ba   : > { %1725 = vmatprep.subr.bf16.mxu1 %v1724_v37 }
 0x1bb   : > { %1727 = vmatpush3.bf16.msra.mxu1 %v1724_v37 }
 0x1be   : > { %1655 = vmatmul.mubr.msk.f32.vlgmr.msra.gmra.mrb[16].mxu1 %vm1077_vm3, %v2205_v40  ;;  %v1175_v40 = vld [vmem:[%s2372_s7 + $0x10] sm:$0xff] (!%p1487_p13) }
 0x1bf   : > { %v1732_v49 = vpack.c.bf16 (!%p1487_p13), %v1176_v48, %v1175_v40 }
 0x1c1   : > { %1733 = vmatprep.subr.bf16.mxu0 (!%p1487_p13), %v1732_v49 }
 0x1c2   : > { %1735 = vmatpush3.bf16.msra.mxu0 (!%p1487_p13), %v1732_v49 }
 0x1c3   : > { %1737 = vmatprep.subr.bf16.mxu0 (!%p1487_p13), %v1736_v52 }
 0x1c6   : > { %1739 = vmatpush3.bf16.msra.mxu0 (!%p1487_p13), %v1736_v52 }
 0x1c7   : > { %1741 = vmatprep.subr.bf16.mxu0 (!%p1487_p13), %v1740_v56 }
 0x1ca   : > { %1743 = vmatpush3.bf16.msra.mxu0 (!%p1487_p13), %v1740_v56 }
 0x1cb   : > { %1745 = vmatprep.subr.bf16.mxu0 (!%p1487_p13), %v1744_v59 }
 0x1ce   : > { %1747 = vmatpush3.bf16.msra.mxu0 (!%p1487_p13), %v1744_v59 }
 0x1cf   : > { %1749 = vmatprep.subr.bf16.mxu0 (!%p1487_p13), %v1748_v62 }
 0x1d2   : > { %1751 = vmatpush3.bf16.msra.mxu0 (!%p1487_p13), %v1748_v62 }
 0x1d3   : > { %1753 = vmatprep.subr.bf16.mxu0 (!%p1487_p13), %v1752_v1 }
 0x1d6   : > { %1755 = vmatpush3.bf16.msra.mxu0 (!%p1487_p13), %v1752_v1 }
 0x1d7   : > { %1757 = vmatprep.subr.bf16.mxu0 (!%p1487_p13), %v1756_v4 }
 0x1da   : > { %1759 = vmatpush3.bf16.msra.mxu0 (!%p1487_p13), %v1756_v4 }
 0x28f   : > { %1170 = sbr.rel (%p1487_p13) target bundleno = 890 (0x37a), region = 64 }
 0x291   : > { %v1656_v42 = vpop.f32.mrb[16].mxu1 }
 0x292   : > { %v1164_v44 = vadd.f32 %v1656_v42, %v1087_v38  ;;  %v1154_v45 = vpop.f32.mrb[17].mxu1 }
 0x293   : > { %v1163_v39 = vadd.f32 %v1154_v45, %v1086_v41 }
 0x294   : > { %1166 = vst [vmem:[#allocation2 + $0x8] sm:$0xff] %v1164_v44 }
 0x295   : > { %1165 = vst [vmem:[#allocation2] sm:$0xff] %v1163_v39 }
 0x29b   : > { %v1172_v5 = vld [vmem:[#allocation2 + $0x8] sm:$0xff] }
 0x29c   : > { %v1171_v53 = vld [vmem:[#allocation2] sm:$0xff] }
 0x29d   : > { %1689 = vmatprep.mubr.f32.mxu0 %v1171_v53 }
 0x29e   : > { %1690 = vmatmul.mubr.f32.vlgmr.msra.gmra.mrb[0].mxu0 %v1172_v5 }
 0x371   : > { %v1691_v7 = vpop.f32.mrb[0].mxu0 }
 0x372   : > { %v1268_v8 = vadd.f32 %v1691_v7, %v1488_v6  ;;  %v1262_v9 = vpop.f32.mrb[1].mxu0 }
 0x373   : > { %v1263_v10 = vadd.f32 %v1488_v6, %v1262_v9 }
 0x374   : > { %v1272_v11 = vadd.f32 %v1268_v8, %v1172_v5 }
 0x375   : > { %v1271_v12 = vadd.f32 %v1263_v10, %v1171_v53 }
 0x376   : > { %v1274_v13 = vmax.f32 %v1272_v11, 0.0 }
 0x377   : > { %v1273_v14 = vmax.f32 %v1271_v12, 0.0 }
 0x378   : > { %1276 = vst [vmem:[#allocation2 + $0x8] sm:$0xff] %v1274_v13 }
 0x379   : > { %1275 = vst [vmem:[#allocation2] sm:$0xff] %v1273_v14 }
 0x37a PF: > { %s1908_s28 = smov [#allocation2]  }
 0x37b   : > { %s1288_s30 = sshll.u32 %s1908_s28, 4  ;;  %s1289_s30 = int_to_ptr.vmem [resolvable:$true] %s1288_s30 }
 0x37c   : > { %s1812_s11 = scalar_lea.vmem %s1289_s30, 256  ;;  %p1819_p4 = scmp.lt.s32.totalorder %s1289_s30, %s1289_s30 }
 0x37d   : > { %p1813_p0 = scmp.ne.s32.totalorder %s1289_s30, %s1812_s11  ;;  %p1820_p7 = scmp.lt.s32.totalorder %s1812_s11, %s1812_s11 }
 0x37f   : > { %p1814_p1 = pnand %p1813_p0, %p273_p2  ;;  %p1821_p8 = por %p1820_p7, %p1819_p4 }
 0x381   : > { %p1815_p3 = pneg %p1814_p1 }
 0x383   : > { %p1822_p9 = pnand %p1821_p8, %p1815_p3 }
 0x385   : > { %1825 = shalt.err (!%p1822_p9)
}
 0x386   : > { %s1826_s22 = scalar_lea.hbm %s2374_s9, 256 }
 0x387   : > { %p1827_p10 = scmp.ne.s32.totalorder %s2374_s9, %s1826_s22  ;;  %p1832_p13 = scmp.lt.u32.totalorder %s1826_s22, %s2374_s9 }
 0x389   : > { %p1828_p11 = pnand %p1827_p10, %p273_p2 }
 0x38b   : > { %p1829_p12 = pneg %p1828_p11 }
 0x38d   : > { %p1834_p0 = pnand %p1832_p13, %p1829_p12 }
 0x38f   : > { %1837 = shalt.err (!%p1834_p0)
}
 0x390   : > { %s1909_s12 = smov 128   ;;  %s1910_s20 = smov 8  }
 0x391   : > { %1761 = dma.vmem_to_hbm [thread:$0]  (%p273_p2), %s1289_s30, 256, %s2374_s9, [#allocation3], %s1909_s12, %s1909_s12, %s1910_s20  }
 0x392   : > { %s1496_s13 = sshll.u32 %s1988_s17, 11  ;;  %s1304_s15 = sshll.u32 %s2043_s16, 4  ;;  %s2313_s15 = int_to_ptr.vmem [resolvable:$true] %s1304_s15 }
 0x393   : > { %s2311_s29 = scalar_lea.hbm %s2375_s10, %s1496_s13  ;;  %s2391_s19 = sand.u32 1, %s1896_s14  }
 0x394   : > { %s2317_s22 = scalar_lea.sflag [#allocation5], %s2391_s19  ;;  %s1838_s24 = scalar_lea.vmem %s2313_s15, 2048 }
 0x395   : > { %p1839_p1 = scmp.ne.s32.totalorder %s2313_s15, %s1838_s24  ;;  %s1911_s30 = smov [#allocation4]  }
 0x396   : > { %s1842_s16 = sshll.u32 %s1911_s30, 4  ;;  %s1843_s16 = int_to_ptr.vmem [resolvable:$false] %s1842_s16 }
 0x397   : > { %p1840_p3 = pnand %p1839_p1, %p2007_p5  ;;  %s1844_s25 = scalar_lea.vmem %s1843_s16, 4096 }
 0x398   : > { %p1845_p7 = scmp.lt.s32.totalorder %s2313_s15, %s1843_s16  ;;  %p1846_p8 = scmp.lt.s32.totalorder %s1844_s25, %s1838_s24 }
 0x399   : > { %p1841_p4 = pneg %p1840_p3 }
 0x39a   : > { %p1847_p9 = por %p1846_p8, %p1845_p7 }
 0x39c   : > { %p1848_p10 = pnand %p1847_p9, %p1841_p4 }
 0x39e   : > { %1851 = shalt.err (!%p1848_p10)
}
 0x39f   : > { %s1852_s27 = scalar_lea.hbm %s2311_s29, 2048  ;;  %s1856_s26 = scalar_lea.hbm %s2375_s10, 4096 }
 0x3a0   : > { %p1853_p11 = scmp.ne.s32.totalorder %s2311_s29, %s1852_s27  ;;  %p1857_p0 = scmp.lt.u32.totalorder %s2311_s29, %s2375_s10 }
 0x3a1   : > { %p1858_p1 = scmp.lt.u32.totalorder %s1856_s26, %s1852_s27  ;;  %p1860_p4 = scmp.lt.u32.totalorder %s1852_s27, %s2311_s29 }
 0x3a2   : > { %p1854_p12 = pnand %p1853_p11, %p2007_p5 }
 0x3a3   : > { %p1859_p3 = por %p1858_p1, %p1857_p0 }
 0x3a4   : > { %p1855_p13 = pneg %p1854_p12 }
 0x3a5   : > { %p1861_p7 = por %p1860_p4, %p1859_p3 }
 0x3a7   : > { %p1862_p8 = pnand %p1861_p7, %p1855_p13 }
 0x3a9   : > { %1865 = shalt.err (!%p1862_p8)
}
 0x3aa   : > { %1762 = dma.vmem_to_hbm [thread:$0]  (%p2007_p5), %s2313_s15, 2048, %s2311_s29, %s2317_s22, %s1909_s12, %s1909_s12, %s1910_s20  }
 0x3ab   : > { %1883 = dma.done.wait (%p273_p2), [#allocation3], 256  }
 0x3ac   : > { %1885 = vsyncadd (%p273_p2), [#allocation3], 4294967040 }
 0x3ad PF: > { %s2392_s11 = sld [smem:[#allocation10_spill]]  ;;  %s2393_s19 = sld [smem:[#allocation8_spill]] }
 0x3b3   : > { %p1772_p9 = scmp.ge.s32.totalorder %s2392_s11, 2  ;;  %s1323_s30 = sand.u32 1, %s2393_s19  }
 0x3b4   : > { %s1324_s23 = scalar_lea.sflag [#allocation5], %s1323_s30 }
 0x3b5   : > { %p1767_p10 = pnand %p1772_p9, %p2011_p6 }
 0x3b7   : > { %1887 = dma.done.wait (!%p1767_p10), %s1324_s23, 2048  }
 0x3b8   : > { %1889 = vsyncadd (!%p1767_p10), %s1324_s23, 4294965248  ;;  %s2395_s16 = sld [smem:[#allocation11_spill]]  ;;  %s2396_s25 = sld [smem:[#allocation9_spill]] }
 0x3b9   : > { %s2397_s15 = sld [smem:[#allocation12_spill]]  ;;  %s2398_s13 = smov %s1896_s14 }
 0x3be   : > { %p22_p5 = scmp.ge.s32.totalorder %s2395_s16, 4   ;;  %s2399_s14 = smov %s2396_s25 }
 0x3c0   :  { %24 = sbr.rel (!%p22_p5) target bundleno = 4 (0x4), region = 117 }
 0x3c7   :  { %1329 = vsyncpa [#allocation3], 1 }
 0x3c8   :  { %1331 = vsyncpa [#allocation3 + $0x1], 1 }
 0x3c9   :  { %1332 = vsyncpa [#allocation5], 1 }
 0x3ca   :  { %1334 = vsyncpa [#allocation5 + $0x1], 1 }

</bundles_post_ra>
